<compile_context>
chip_gen: v7x
topology: tpu7x:2x2x1
jax: 0.10.0
libtpu: 0.0.40
codegen_flags: <defaults>
</compile_context>

<pallas_src>
import jax
import jax.numpy as jnp
from jax.experimental import pallas as pl
from jax.experimental.pallas import tpu as pltpu

LANE = 128


def mlp_kernel(x_ref,
               w1_ref, b1_ref,
               w2_ref, b2_ref,
               w3_ref, b3_ref,
               w4_ref, b4_ref,
               o_ref):
    """Whole 4-layer MLP for one batch tile; bf16 MXU matmuls, f32 accumulation/bias/ReLU."""

    def layer(h_bf16, w_ref, b_ref, relu):
        acc = jnp.dot(h_bf16, w_ref[...], preferred_element_type=jnp.float32)
        acc = acc + b_ref[...]
        return jnp.maximum(acc, 0.0) if relu else acc

    h = x_ref[...].astype(jnp.bfloat16)
    h = layer(h, w1_ref, b1_ref, relu=True).astype(jnp.bfloat16)
    # Dropout(0.2) -> identity (eval mode)
    h = layer(h, w2_ref, b2_ref, relu=True).astype(jnp.bfloat16)
    h = layer(h, w3_ref, b3_ref, relu=True).astype(jnp.bfloat16)
    o_ref[...] = layer(h, w4_ref, b4_ref, relu=False)


def _round_up(n, m):
    return ((n + m - 1) // m) * m


def _cdiv(a, b):
    return (a + b - 1) // b


def _pad2(a, rows, cols):
    """Zero-pad a 2D array up to (rows, cols)."""
    if a.shape == (rows, cols):
        return a
    out = jnp.zeros((rows, cols), a.dtype)
    return out.at[:a.shape[0], :a.shape[1]].set(a)


def polymer_predictor_forward(x, params, *, max_tile_m=2048, lane_dense_out_max_rows=1024):
    """x: [B, input_dim] float32.  params: list of (W, b) with W [in, out], b [1, out]."""
    B, in_dim = x.shape
    (w1, b1), (w2, b2), (w3, b3), (w4, b4) = params
    out_dim = w4.shape[1]

    # --- Balanced batch tiling (whole batch in one tile when it fits). ---
    num_tiles = _cdiv(B, max_tile_m)
    if num_tiles > 1 and num_tiles % 2 == 1:
        num_tiles += 1                      # even grid count -> both v7x TensorCores busy
    tile_m = _round_up(_cdiv(B, num_tiles), 8)
    B_pad = _round_up(B, tile_m)            # padded rows produce garbage; sliced off below
    grid_m = B_pad // tile_m
    x_p = x if B_pad == B else jnp.pad(x, ((0, B_pad - B), (0, 0)))

    # --- Output width: lane-dense (128) only for small batches, true width otherwise. ---
    if B_pad <= lane_dense_out_max_rows:
        out_pad = _round_up(max(out_dim, LANE), LANE)
    else:
        out_pad = out_dim

    # --- Pad hidden widths to 128 lanes; weights bf16 at rest, biases stay f32. ---
    h1 = _round_up(w1.shape[1], LANE)
    h2 = _round_up(w2.shape[1], LANE)
    h3 = _round_up(w3.shape[1], LANE)

    w1p = _pad2(w1, in_dim, h1).astype(jnp.bfloat16)
    b1p = _pad2(b1, 1, h1)
    w2p = _pad2(w2, h1, h2).astype(jnp.bfloat16)
    b2p = _pad2(b2, 1, h2)
    w3p = _pad2(w3, h2, h3).astype(jnp.bfloat16)
    b3p = _pad2(b3, 1, h3)
    w4p = _pad2(w4, h3, out_pad).astype(jnp.bfloat16)
    b4p = _pad2(b4, 1, out_pad)

    # Weights/biases: full (untiled) blocks, constant index across the grid (resident in VMEM).
    def full_spec(arr):
        return pl.BlockSpec(arr.shape, lambda i: (0, 0))

    out_full = pl.pallas_call(
        mlp_kernel,
        out_shape=jax.ShapeDtypeStruct((B_pad, out_pad), jnp.float32),
        grid_spec=pltpu.PrefetchScalarGridSpec(
            num_scalar_prefetch=0,
            grid=(grid_m,),
            in_specs=[
                pl.BlockSpec((tile_m, in_dim), lambda i: (i, 0)),
                full_spec(w1p), full_spec(b1p),
                full_spec(w2p), full_spec(b2p),
                full_spec(w3p), full_spec(b3p),
                full_spec(w4p), full_spec(b4p),
            ],
            out_specs=pl.BlockSpec((tile_m, out_pad), lambda i: (i, 0)),
        ),
        compiler_params=pltpu.CompilerParams(
            dimension_semantics=("parallel",)),
    )(x_p, w1p, b1p, w2p, b2p, w3p, b3p, w4p, b4p)

    return out_full[:B, :out_dim]


def init_params(key, input_dim, hidden_dims, out_dim=2):
    """Deterministic Kaiming-uniform-ish init matching nn.Linear shapes (W stored [in, out])."""
    dims = [input_dim] + list(hidden_dims) + [out_dim]
    params = []
    for i in range(len(dims) - 1):
        key, kw, kb = jax.random.split(key, 3)
        fan_in, fan_out = dims[i], dims[i + 1]
        bound = 1.0 / jnp.sqrt(fan_in)
        W = jax.random.uniform(kw, (fan_in, fan_out), jnp.float32, -bound, bound)
        b = jax.random.uniform(kb, (1, fan_out), jnp.float32, -bound, bound)
        params.append((W, b))
    return params


def reference_forward(x, params):
    """Pure-JAX reference with the same bf16-matmul / f32-accumulate numerics."""
    h = x
    for i, (W, b) in enumerate(params):
        h = jnp.dot(h.astype(jnp.bfloat16), W.astype(jnp.bfloat16),
                    preferred_element_type=jnp.float32) + b
        if i < len(params) - 1:
            h = jnp.maximum(h, 0.0)
    return h


if __name__ == "__main__":
    key = jax.random.PRNGKey(0)
    input_dim = 16
    hidden_dims = [128, 64, 32]

    key, kp = jax.random.split(key)
    params = init_params(kp, input_dim, hidden_dims, out_dim=2)

    # Path 1: small batch -> single-step grid, lane-dense (128-lane padded) output store.
    key, kx = jax.random.split(key)
    x_small = jax.random.normal(kx, (32, input_dim), jnp.float32)
    out_small = jax.block_until_ready(polymer_predictor_forward(x_small, params))
    ref_small = reference_forward(x_small, params)
    assert out_small.shape == (32, 2), out_small.shape
    assert jnp.allclose(out_small, ref_small, atol=2e-3, rtol=2e-3), "small-batch mismatch"

    # Path 2: larger batch -> multi-tile (even count) grid, unpadded out_dim=2 output stream.
    key, kx2 = jax.random.split(key)
    x_big = jax.random.normal(kx2, (2500, input_dim), jnp.float32)
    out_big = jax.block_until_ready(polymer_predictor_forward(x_big, params))
    ref_big = reference_forward(x_big, params)
    assert out_big.shape == (2500, 2), out_big.shape
    assert jnp.allclose(out_big, ref_big, atol=2e-3, rtol=2e-3), "large-batch mismatch"

    print("KERNEL_OK")
</pallas_src>

<mosaic_0001>
module attributes {stable_mosaic.version = 11 : i64} {
  func.func @mlp_kernel(%arg0: i32, %arg1: memref<32x16xf32, #tpu.memory_space<vmem>>, %arg2: memref<16x128xbf16, #tpu.memory_space<vmem>>, %arg3: memref<1x128xf32, #tpu.memory_space<vmem>>, %arg4: memref<128x128xbf16, #tpu.memory_space<vmem>>, %arg5: memref<1x128xf32, #tpu.memory_space<vmem>>, %arg6: memref<128x128xbf16, #tpu.memory_space<vmem>>, %arg7: memref<1x128xf32, #tpu.memory_space<vmem>>, %arg8: memref<128x128xbf16, #tpu.memory_space<vmem>>, %arg9: memref<1x128xf32, #tpu.memory_space<vmem>>, %arg10: memref<32x128xf32, #tpu.memory_space<vmem>>) attributes {dimension_semantics = [#tpu.dimension_semantics<parallel>], iteration_bounds = array<i64: 1>, scalar_prefetch = 0 : i64, scratch_operands = 0 : i64, tpu.core_type = #tpu.core_type<tc>, window_params = [{transform_indices = @transform_0, window_bounds = array<i64: 32, 16>}, {pipeline_mode = #tpu.pipeline_mode<synchronous>, transform_indices = @transform_1, window_bounds = array<i64: 16, 128>}, {pipeline_mode = #tpu.pipeline_mode<synchronous>, transform_indices = @transform_2, window_bounds = array<i64: 1, 128>}, {pipeline_mode = #tpu.pipeline_mode<synchronous>, transform_indices = @transform_3, window_bounds = array<i64: 128, 128>}, {pipeline_mode = #tpu.pipeline_mode<synchronous>, transform_indices = @transform_4, window_bounds = array<i64: 1, 128>}, {pipeline_mode = #tpu.pipeline_mode<synchronous>, transform_indices = @transform_5, window_bounds = array<i64: 128, 128>}, {pipeline_mode = #tpu.pipeline_mode<synchronous>, transform_indices = @transform_6, window_bounds = array<i64: 1, 128>}, {pipeline_mode = #tpu.pipeline_mode<synchronous>, transform_indices = @transform_7, window_bounds = array<i64: 128, 128>}, {pipeline_mode = #tpu.pipeline_mode<synchronous>, transform_indices = @transform_8, window_bounds = array<i64: 1, 128>}, {transform_indices = @transform_9, window_bounds = array<i64: 32, 128>}]} {
    %c0 = arith.constant 0 : index
    %c0_0 = arith.constant 0 : index
    %0 = vector.load %arg1[%c0, %c0_0] : memref<32x16xf32, #tpu.memory_space<vmem>>, vector<32x16xf32>
    %1 = arith.truncf %0 : vector<32x16xf32> to vector<32x16xbf16>
    %c0_1 = arith.constant 0 : index
    %c0_2 = arith.constant 0 : index
    %2 = vector.load %arg2[%c0_1, %c0_2] : memref<16x128xbf16, #tpu.memory_space<vmem>>, vector<16x128xbf16>
    %cst = arith.constant dense<0.000000e+00> : vector<32x128xf32>
    %3 = tpu.matmul %1, %2, %cst {dimension_numbers = #tpu.dot_dimension_numbers<[1], [0], [0], [1], [0, 0, 1, 1], [], []>} : vector<32x16xbf16>, vector<16x128xbf16>, vector<32x128xf32> -> vector<32x128xf32>
    %c0_3 = arith.constant 0 : index
    %c0_4 = arith.constant 0 : index
    %4 = vector.load %arg3[%c0_3, %c0_4] : memref<1x128xf32, #tpu.memory_space<vmem>>, vector<1x128xf32>
    %5 = vector.broadcast %4 : vector<1x128xf32> to vector<32x128xf32>
    %6 = arith.addf %3, %5 : vector<32x128xf32>
    %cst_5 = arith.constant 0.000000e+00 : f32
    %7 = vector.broadcast %cst_5 : f32 to vector<32x128xf32>
    %8 = arith.maximumf %6, %7 : vector<32x128xf32>
    %9 = arith.truncf %8 : vector<32x128xf32> to vector<32x128xbf16>
    %c0_6 = arith.constant 0 : index
    %c0_7 = arith.constant 0 : index
    %10 = vector.load %arg4[%c0_6, %c0_7] : memref<128x128xbf16, #tpu.memory_space<vmem>>, vector<128x128xbf16>
    %cst_8 = arith.constant dense<0.000000e+00> : vector<32x128xf32>
    %11 = tpu.matmul %9, %10, %cst_8 {dimension_numbers = #tpu.dot_dimension_numbers<[1], [0], [0], [1], [0, 0, 1, 1], [], []>} : vector<32x128xbf16>, vector<128x128xbf16>, vector<32x128xf32> -> vector<32x128xf32>
    %c0_9 = arith.constant 0 : index
    %c0_10 = arith.constant 0 : index
    %12 = vector.load %arg5[%c0_9, %c0_10] : memref<1x128xf32, #tpu.memory_space<vmem>>, vector<1x128xf32>
    %13 = vector.broadcast %12 : vector<1x128xf32> to vector<32x128xf32>
    %14 = arith.addf %11, %13 : vector<32x128xf32>
    %cst_11 = arith.constant 0.000000e+00 : f32
    %15 = vector.broadcast %cst_11 : f32 to vector<32x128xf32>
    %16 = arith.maximumf %14, %15 : vector<32x128xf32>
    %17 = arith.truncf %16 : vector<32x128xf32> to vector<32x128xbf16>
    %c0_12 = arith.constant 0 : index
    %c0_13 = arith.constant 0 : index
    %18 = vector.load %arg6[%c0_12, %c0_13] : memref<128x128xbf16, #tpu.memory_space<vmem>>, vector<128x128xbf16>
    %cst_14 = arith.constant dense<0.000000e+00> : vector<32x128xf32>
    %19 = tpu.matmul %17, %18, %cst_14 {dimension_numbers = #tpu.dot_dimension_numbers<[1], [0], [0], [1], [0, 0, 1, 1], [], []>} : vector<32x128xbf16>, vector<128x128xbf16>, vector<32x128xf32> -> vector<32x128xf32>
    %c0_15 = arith.constant 0 : index
    %c0_16 = arith.constant 0 : index
    %20 = vector.load %arg7[%c0_15, %c0_16] : memref<1x128xf32, #tpu.memory_space<vmem>>, vector<1x128xf32>
    %21 = vector.broadcast %20 : vector<1x128xf32> to vector<32x128xf32>
    %22 = arith.addf %19, %21 : vector<32x128xf32>
    %cst_17 = arith.constant 0.000000e+00 : f32
    %23 = vector.broadcast %cst_17 : f32 to vector<32x128xf32>
    %24 = arith.maximumf %22, %23 : vector<32x128xf32>
    %25 = arith.truncf %24 : vector<32x128xf32> to vector<32x128xbf16>
    %c0_18 = arith.constant 0 : index
    %c0_19 = arith.constant 0 : index
    %26 = vector.load %arg8[%c0_18, %c0_19] : memref<128x128xbf16, #tpu.memory_space<vmem>>, vector<128x128xbf16>
    %cst_20 = arith.constant dense<0.000000e+00> : vector<32x128xf32>
    %27 = tpu.matmul %25, %26, %cst_20 {dimension_numbers = #tpu.dot_dimension_numbers<[1], [0], [0], [1], [0, 0, 1, 1], [], []>} : vector<32x128xbf16>, vector<128x128xbf16>, vector<32x128xf32> -> vector<32x128xf32>
    %c0_21 = arith.constant 0 : index
    %c0_22 = arith.constant 0 : index
    %28 = vector.load %arg9[%c0_21, %c0_22] : memref<1x128xf32, #tpu.memory_space<vmem>>, vector<1x128xf32>
    %29 = vector.broadcast %28 : vector<1x128xf32> to vector<32x128xf32>
    %30 = arith.addf %27, %29 : vector<32x128xf32>
    %c0_23 = arith.constant 0 : index
    %c0_24 = arith.constant 0 : index
    %31 = vector.load %arg10[%c0_23, %c0_24] : memref<32x128xf32, #tpu.memory_space<vmem>>, vector<32x128xf32>
    tpu.vector_store %arg10[%c0_23, %c0_24], %30 {strides = array<i32>} : memref<32x128xf32, #tpu.memory_space<vmem>>, vector<32x128xf32>,
    return
  }
  func.func @transform_0(%arg0: i32) -> (i32, i32) {
    %c0_i32 = arith.constant 0 : i32
    %c0_i32_0 = arith.constant 0 : i32
    return %arg0, %c0_i32 : i32, i32
  }
  func.func @transform_1(%arg0: i32) -> (i32, i32) {
    %c0_i32 = arith.constant 0 : i32
    %c0_i32_0 = arith.constant 0 : i32
    %c0_i32_1 = arith.constant 0 : i32
    return %c0_i32, %c0_i32_0 : i32, i32
  }
  func.func @transform_2(%arg0: i32) -> (i32, i32) {
    %c0_i32 = arith.constant 0 : i32
    %c0_i32_0 = arith.constant 0 : i32
    %c0_i32_1 = arith.constant 0 : i32
    return %c0_i32, %c0_i32_0 : i32, i32
  }
  func.func @transform_3(%arg0: i32) -> (i32, i32) {
    %c0_i32 = arith.constant 0 : i32
    %c0_i32_0 = arith.constant 0 : i32
    %c0_i32_1 = arith.constant 0 : i32
    return %c0_i32, %c0_i32_0 : i32, i32
  }
  func.func @transform_4(%arg0: i32) -> (i32, i32) {
    %c0_i32 = arith.constant 0 : i32
    %c0_i32_0 = arith.constant 0 : i32
    %c0_i32_1 = arith.constant 0 : i32
    return %c0_i32, %c0_i32_0 : i32, i32
  }
  func.func @transform_5(%arg0: i32) -> (i32, i32) {
    %c0_i32 = arith.constant 0 : i32
    %c0_i32_0 = arith.constant 0 : i32
    %c0_i32_1 = arith.constant 0 : i32
    return %c0_i32, %c0_i32_0 : i32, i32
  }
  func.func @transform_6(%arg0: i32) -> (i32, i32) {
    %c0_i32 = arith.constant 0 : i32
    %c0_i32_0 = arith.constant 0 : i32
    %c0_i32_1 = arith.constant 0 : i32
    return %c0_i32, %c0_i32_0 : i32, i32
  }
  func.func @transform_7(%arg0: i32) -> (i32, i32) {
    %c0_i32 = arith.constant 0 : i32
    %c0_i32_0 = arith.constant 0 : i32
    %c0_i32_1 = arith.constant 0 : i32
    return %c0_i32, %c0_i32_0 : i32, i32
  }
  func.func @transform_8(%arg0: i32) -> (i32, i32) {
    %c0_i32 = arith.constant 0 : i32
    %c0_i32_0 = arith.constant 0 : i32
    %c0_i32_1 = arith.constant 0 : i32
    return %c0_i32, %c0_i32_0 : i32, i32
  }
  func.func @transform_9(%arg0: i32) -> (i32, i32) {
    %c0_i32 = arith.constant 0 : i32
    %c0_i32_0 = arith.constant 0 : i32
    return %arg0, %c0_i32 : i32, i32
  }
}

</mosaic_0001>

<bundles_post_ra>
// kernel: tpu_custom_call.1
= control target key start
LH: loop header
LB: loop body
LE: loop exit
PB: predicated region body
PF: predicated region fallthrough
CT: control target
= control target key end

     0   :  { %14 = vsyncpa [#allocation3], 0  ;;  %s979_s0 = inlined_call_operand.vmem [shape: f32[32,16], index: 0, kind: input, shape index: {}]   ;;  %s980_s1 = inlined_call_operand.hbm [shape: bf16[16,128], index: 1, kind: input, shape index: {}]   ;;  %s981_s2 = inlined_call_operand.vmem [shape: f32[1,128], index: 2, kind: input, shape index: {}]   ;;  %s982_s3 = inlined_call_operand.hbm [shape: bf16[128,128], index: 3, kind: input, shape index: {}]   ;;  %s983_s4 = inlined_call_operand.vmem [shape: f32[1,128], index: 4, kind: input, shape index: {}]   ;;  %s984_s5 = inlined_call_operand.vmem [shape: bf16[128,128], index: 5, kind: input, shape index: {}]   ;;  %s985_s6 = inlined_call_operand.vmem [shape: f32[1,128], index: 6, kind: input, shape index: {}]   ;;  %s986_s7 = inlined_call_operand.hbm [shape: bf16[128,128], index: 7, kind: input, shape index: {}]   ;;  %s987_s8 = inlined_call_operand.vmem [shape: f32[1,128], index: 8, kind: input, shape index: {}]   ;;  %s988_s9 = inlined_call_operand.hbm [shape: f32[32,128], index: 9, kind: output, shape index: {}]  }
   0x1   :  { %15 = vsyncpa [#allocation6], 0 }
   0x2   :  { %16 = vsyncpa [#allocation4], 0  ;;  %s809_s30 = smov [#allocation5]   ;;  %s810_s11 = smov [#allocation2]  }
   0x3   :  { %s38_s10 = sshll.u32 %s809_s30, 4  ;;  %s24_s12 = sshll.u32 %s810_s11, 4  ;;  %s39_s10 = int_to_ptr.vmem [resolvable:$true] %s38_s10  ;;  %s867_s12 = int_to_ptr.vmem [resolvable:$true] %s24_s12 }
   0x4   :  { %s715_s15 = scalar_lea.hbm %s982_s3, 1024 }
   0x5   :  { %p716_p0 = scmp.ne.s32.totalorder %s982_s3, %s715_s15  ;;  %p719_p1 = scmp.lt.u32.totalorder %s715_s15, %s982_s3 }
   0x7   :  { %p721_p2 = pnand %p719_p1, %p716_p0 }
   0x9   :  { %724 = shalt.err (!%p721_p2)
}
   0xa   :  { %s725_s20 = scalar_lea.vmem %s39_s10, 1024  ;;  %p730_p4 = scmp.lt.s32.totalorder %s39_s10, %s39_s10 }
   0xb   :  { %p726_p3 = scmp.ne.s32.totalorder %s39_s10, %s725_s20  ;;  %p731_p5 = scmp.lt.s32.totalorder %s725_s20, %s725_s20 }
   0xd   :  { %p732_p6 = por %p731_p5, %p730_p4 }
   0xf   :  { %p733_p7 = pnand %p732_p6, %p726_p3 }
  0x11   :  { %736 = shalt.err (!%p733_p7)
}
  0x12   :  { %s811_s21 = smov 64   ;;  %s812_s22 = smov 4  }
  0x13   :  { %44 = dma.hbm_to_vmem [thread:$0]  %s982_s3, 1024, %s39_s10, [#allocation6], %s811_s21, %s811_s21, %s812_s22  }
  0x14   :  { %s737_s27 = scalar_lea.hbm %s980_s1, 128 }
  0x15   :  { %p738_p8 = scmp.ne.s32.totalorder %s980_s1, %s737_s27  ;;  %p741_p9 = scmp.lt.u32.totalorder %s737_s27, %s980_s1 }
  0x17   :  { %p743_p10 = pnand %p741_p9, %p738_p8 }
  0x19   :  { %746 = shalt.err (!%p743_p10)
}
  0x1a   :  { %s747_s13 = scalar_lea.vmem %s867_s12, 128  ;;  %p752_p12 = scmp.lt.s32.totalorder %s867_s12, %s867_s12 }
  0x1b   :  { %p748_p11 = scmp.ne.s32.totalorder %s867_s12, %s747_s13  ;;  %p753_p13 = scmp.lt.s32.totalorder %s747_s13, %s747_s13 }
  0x1d   :  { %p754_p0 = por %p753_p13, %p752_p12 }
  0x1f   :  { %p755_p1 = pnand %p754_p0, %p748_p11 }
  0x21   :  { %758 = shalt.err (!%p755_p1)
}
  0x22   :  { %30 = dma.hbm_to_vmem [thread:$0]  %s980_s1, 128, %s867_s12, [#allocation3], %s811_s21, %s811_s21, %s812_s22  }
  0x23   :  { %s813_s14 = smov [#allocation7]   ;;  %s759_s18 = scalar_lea.hbm %s986_s7, 1024 }
  0x24   :  { %s56_s15 = sshll.u32 %s813_s14, 4  ;;  %p760_p2 = scmp.ne.s32.totalorder %s986_s7, %s759_s18  ;;  %s57_s15 = int_to_ptr.vmem [resolvable:$true] %s56_s15 }
  0x25   :  { %p763_p3 = scmp.lt.u32.totalorder %s759_s18, %s986_s7 }
  0x27   :  { %p765_p4 = pnand %p763_p3, %p760_p2 }
  0x29   :  { %768 = shalt.err (!%p765_p4)
}
  0x2a   :  { %s769_s25 = scalar_lea.vmem %s57_s15, 1024  ;;  %p774_p6 = scmp.lt.s32.totalorder %s57_s15, %s57_s15 }
  0x2b   :  { %p770_p5 = scmp.ne.s32.totalorder %s57_s15, %s769_s25  ;;  %p775_p7 = scmp.lt.s32.totalorder %s769_s25, %s769_s25 }
  0x2d   :  { %p776_p8 = por %p775_p7, %p774_p6 }
  0x2f   :  { %p777_p9 = pnand %p776_p8, %p770_p5 }
  0x31   :  { %780 = shalt.err (!%p777_p9)
}
  0x32   :  { %62 = dma.hbm_to_vmem [thread:$0]  %s986_s7, 1024, %s57_s15, [#allocation6], %s811_s21, %s811_s21, %s812_s22  }
  0x33   :  { %803 = dma.done.wait [#allocation3], 128  }
  0x34   :  { %804 = vsyncadd [#allocation3], 4294967168 }
  0x35   :  { %805 = dma.done.wait [#allocation6], 2048  }
  0x36   :  { %806 = vsyncadd [#allocation6], 4294965248  ;;  %v690_v0 = vld [vmem:[#allocation2] sm:$0xff]   ;;  %v76_v2 = vld [vmem:[%s979_s0 + $0x8] sm:$0xff]  ;;  %vm96_vm0 = vcmask 130048  }
  0x37   :  { %v75_v1 = vld [vmem:[%s979_s0] sm:$0xff]  ;;  %v77_v3 = vld [vmem:[%s979_s0 + $0x10] sm:$0xff]  ;;  %616 = vmatprep.subr.bf16.mxu0 %v690_v0  ;;  %v78_v5 = vld [vmem:[%s979_s0 + $0x18] sm:$0xff] }
  0x38   :  { %v79_v4 = vpack.c.bf16 %v76_v2, %v75_v1  ;;  %617 = vmatpush3.bf16.msra.mxu0 %v690_v0  ;;  %v80_v6 = vpack.c.bf16 %v78_v5, %v77_v3  ;;  %v691_v7 = vld [vmem:[#allocation5] sm:$0xff]   ;;  %v692_v8 = vld [vmem:[#allocation5 + $0x8] sm:$0xff]   ;;  %v693_v9 = vld [vmem:[#allocation5 + $0x10] sm:$0xff]  }
  0x39   :  { %622 = vmatprep.subr.bf16.mxu1 %v691_v7  ;;  %v694_v10 = vld [vmem:[#allocation5 + $0x18] sm:$0xff]   ;;  %v695_v11 = vld [vmem:[#allocation5 + $0x20] sm:$0xff]   ;;  %v696_v12 = vld [vmem:[#allocation5 + $0x28] sm:$0xff]  }
  0x3a   :  { %618 = vmatprep.mubr.msk.bf16.mxu0 %vm96_vm0, %v79_v4  ;;  %623 = vmatpush3.bf16.msra.mxu1 %v691_v7  ;;  %v697_v13 = vld [vmem:[#allocation5 + $0x30] sm:$0xff]   ;;  %v698_v14 = vld [vmem:[#allocation5 + $0x38] sm:$0xff]   ;;  %v700_v16 = vld [vmem:[%s984_s5 + $0x8] sm:$0xff]  }
  0x3b   :  { %619 = vmatmul.mubr.msk.bf16.vlgmr.msra.gmra.mrb[0].mxu0 %vm96_vm0, %v80_v6  ;;  %624 = vmatprep.subr.bf16.mxu1 %v692_v8  ;;  %v699_v15 = vld [vmem:[%s984_s5] sm:$0xff]   ;;  %v701_v17 = vld [vmem:[%s984_s5 + $0x10] sm:$0xff]   ;;  %v702_v18 = vld [vmem:[%s984_s5 + $0x18] sm:$0xff]  }
  0x3c   :  { %642 = vmatprep.subr.bf16.mxu0 %v699_v15  ;;  %v703_v19 = vld [vmem:[%s984_s5 + $0x20] sm:$0xff]   ;;  %v704_v20 = vld [vmem:[%s984_s5 + $0x28] sm:$0xff]   ;;  %v705_v36 = vld [vmem:[%s984_s5 + $0x30] sm:$0xff]  }
  0x3d   :  { %643 = vmatpush3.bf16.msra.mxu0 %v699_v15  ;;  %v552_v21 = vld [vmem:[%s981_s2] ss:$0 sm:$0xff]  ;;  %v706_v37 = vld [vmem:[%s984_s5 + $0x38] sm:$0xff]   ;;  %v707_v38 = vld [vmem:[#allocation7] sm:$0xff]  }
  0x3e   :  { %625 = vmatpush3.bf16.msra.mxu1 %v692_v8  ;;  %644 = vmatprep.subr.bf16.mxu0 %v700_v16  ;;  %v708_v39 = vld [vmem:[#allocation7 + $0x8] sm:$0xff]   ;;  %v709_v40 = vld [vmem:[#allocation7 + $0x10] sm:$0xff]   ;;  %v710_v41 = vld [vmem:[#allocation7 + $0x18] sm:$0xff]  }
  0x3f   :  { %626 = vmatprep.subr.bf16.mxu1 %v693_v9  ;;  %v711_v42 = vld [vmem:[#allocation7 + $0x20] sm:$0xff]   ;;  %v712_v43 = vld [vmem:[#allocation7 + $0x28] sm:$0xff]   ;;  %v556_v44 = vld [vmem:[%s983_s4] ss:$0 sm:$0xff] }
  0x40   :  { %v713_v59 = vld [vmem:[#allocation7 + $0x30] sm:$0xff]   ;;  %v714_v60 = vld [vmem:[#allocation7 + $0x38] sm:$0xff]  }
  0x41   :  { %645 = vmatpush3.bf16.msra.mxu0 %v700_v16  ;;  %v565_v61 = vld [vmem:[%s985_s6] ss:$0 sm:$0xff]  ;;  %s814_s6 = smov [#allocation8]  }
  0x42   :  { %627 = vmatpush3.bf16.msra.mxu1 %v693_v9  ;;  %646 = vmatprep.subr.bf16.mxu0 %v701_v17  ;;  %s539_s30 = sshll.u32 %s814_s6, 4  ;;  %s540_s30 = int_to_ptr.vmem [resolvable:$true] %s539_s30 }
  0x43   :  { %628 = vmatprep.subr.bf16.mxu1 %v694_v10  ;;  %s781_s11 = scalar_lea.vmem %s540_s30, 512  ;;  %p786_p11 = scmp.lt.s32.totalorder %s540_s30, %s540_s30 }
  0x44   :  { %p782_p10 = scmp.ne.s32.totalorder %s540_s30, %s781_s11  ;;  %p787_p12 = scmp.lt.s32.totalorder %s781_s11, %s781_s11 }
  0x45   :  { %647 = vmatpush3.bf16.msra.mxu0 %v701_v17 }
  0x46   :  { %629 = vmatpush3.bf16.msra.mxu1 %v694_v10  ;;  %648 = vmatprep.subr.bf16.mxu0 %v702_v18  ;;  %p788_p13 = por %p787_p12, %p786_p11 }
  0x47   :  { %630 = vmatprep.subr.bf16.mxu1 %v695_v11 }
  0x48   :  { %p789_p0 = pnand %p788_p13, %p782_p10 }
  0x49   :  { %649 = vmatpush3.bf16.msra.mxu0 %v702_v18 }
  0x4a   :  { %631 = vmatpush3.bf16.msra.mxu1 %v695_v11  ;;  %650 = vmatprep.subr.bf16.mxu0 %v703_v19 }
  0x4b   :  { %632 = vmatprep.subr.bf16.mxu1 %v696_v12 }
  0x4d   :  { %651 = vmatpush3.bf16.msra.mxu0 %v703_v19 }
  0x4e   :  { %633 = vmatpush3.bf16.msra.mxu1 %v696_v12  ;;  %652 = vmatprep.subr.bf16.mxu0 %v704_v20  ;;  %v574_v12 = vld [vmem:[%s987_s8] ss:$0 sm:$0xff] }
  0x4f   :  { %634 = vmatprep.subr.bf16.mxu1 %v697_v13 }
  0x51   :  { %653 = vmatpush3.bf16.msra.mxu0 %v704_v20 }
  0x52   :  { %635 = vmatpush3.bf16.msra.mxu1 %v697_v13  ;;  %654 = vmatprep.subr.bf16.mxu0 %v705_v36 }
  0x53   :  { %636 = vmatprep.subr.bf16.mxu1 %v698_v14 }
  0x55   :  { %655 = vmatpush3.bf16.msra.mxu0 %v705_v36 }
  0x56   :  { %637 = vmatpush3.bf16.msra.mxu1 %v698_v14  ;;  %656 = vmatprep.subr.bf16.mxu0 %v706_v37 }
  0x57   :  { %662 = vmatprep.subr.bf16.mxu1 %v707_v38 }
  0x59   :  { %657 = vmatpush3.bf16.msra.mxu0 %v706_v37 }
 0x10e   :  { %v620_v22 = vpop.f32.mrb[0].mxu0 }
 0x10f   :  { %v146_v23 = vadd.f32 %v620_v22, %v552_v21  ;;  %v137_v24 = vpop.f32.mrb[1].mxu0 }
 0x110   :  { %v138_v25 = vadd.f32 %v552_v21, %v137_v24  ;;  %v621_v26 = vpop.f32.mrb[2].mxu0 }
 0x111   :  { %v149_v27 = vadd.f32 %v621_v26, %v552_v21  ;;  %v140_v28 = vpop.f32.mrb[3].mxu0  ;;  %v154_v30 = vmax.f32 %v146_v23, 0.0 }
 0x112   :  { %v141_v29 = vadd.f32 %v552_v21, %v140_v28  ;;  %v152_v32 = vmax.f32 %v138_v25, 0.0 }
 0x113   :  { %v155_v31 = vmax.f32 %v149_v27, 0.0 }
 0x114   :  { %v153_v33 = vmax.f32 %v141_v29, 0.0 }
 0x115   :  { %v157_v34 = vpack.c.bf16 %v155_v31, %v154_v30 }
 0x116   :  { %v156_v35 = vpack.c.bf16 %v153_v33, %v152_v32 }
 0x118   :  { %638 = vmatprep.mubr.bf16.mxu1 %v156_v35 }
 0x119   :  { %639 = vmatmul.mubr.bf16.vlgmr.msra.gmra.mrb[0].mxu1 %v157_v34 }
 0x11a   :  { %663 = vmatpush3.bf16.msra.mxu1 %v707_v38 }
 0x11b   :  { %664 = vmatprep.subr.bf16.mxu1 %v708_v39 }
 0x11e   :  { %665 = vmatpush3.bf16.msra.mxu1 %v708_v39 }
 0x11f   :  { %666 = vmatprep.subr.bf16.mxu1 %v709_v40 }
 0x122   :  { %667 = vmatpush3.bf16.msra.mxu1 %v709_v40 }
 0x123   :  { %668 = vmatprep.subr.bf16.mxu1 %v710_v41 }
 0x126   :  { %669 = vmatpush3.bf16.msra.mxu1 %v710_v41 }
 0x127   :  { %670 = vmatprep.subr.bf16.mxu1 %v711_v42 }
 0x12a   :  { %671 = vmatpush3.bf16.msra.mxu1 %v711_v42 }
 0x12b   :  { %672 = vmatprep.subr.bf16.mxu1 %v712_v43 }
 0x12e   :  { %673 = vmatpush3.bf16.msra.mxu1 %v712_v43 }
 0x12f   :  { %674 = vmatprep.subr.bf16.mxu1 %v713_v59 }
 0x132   :  { %675 = vmatpush3.bf16.msra.mxu1 %v713_v59 }
 0x133   :  { %676 = vmatprep.subr.bf16.mxu1 %v714_v60 }
 0x136   :  { %677 = vmatpush3.bf16.msra.mxu1 %v714_v60 }
 0x1ec   :  { %v640_v45 = vpop.f32.mrb[0].mxu1 }
 0x1ed   :  { %v272_v46 = vadd.f32 %v640_v45, %v556_v44  ;;  %v263_v47 = vpop.f32.mrb[1].mxu1 }
 0x1ee   :  { %v264_v48 = vadd.f32 %v556_v44, %v263_v47  ;;  %v641_v49 = vpop.f32.mrb[2].mxu1 }
 0x1ef   :  { %v275_v50 = vadd.f32 %v641_v49, %v556_v44  ;;  %v266_v51 = vpop.f32.mrb[3].mxu1  ;;  %v280_v53 = vmax.f32 %v272_v46, 0.0 }
 0x1f0   :  { %v267_v52 = vadd.f32 %v556_v44, %v266_v51  ;;  %v278_v55 = vmax.f32 %v264_v48, 0.0 }
 0x1f1   :  { %v281_v54 = vmax.f32 %v275_v50, 0.0 }
 0x1f2   :  { %v279_v56 = vmax.f32 %v267_v52, 0.0 }
 0x1f3   :  { %v283_v57 = vpack.c.bf16 %v281_v54, %v280_v53 }
 0x1f4   :  { %v282_v58 = vpack.c.bf16 %v279_v56, %v278_v55 }
 0x1f6   :  { %658 = vmatprep.mubr.bf16.mxu0 %v282_v58 }
 0x1f7   :  { %659 = vmatmul.mubr.bf16.vlgmr.msra.gmra.mrb[4].mxu0 %v283_v57 }
 0x2ca   :  { %v660_v62 = vpop.f32.mrb[4].mxu0 }
 0x2cb   :  { %v398_v63 = vadd.f32 %v660_v62, %v565_v61  ;;  %v389_v0 = vpop.f32.mrb[5].mxu0 }
 0x2cc   :  { %v390_v1 = vadd.f32 %v565_v61, %v389_v0  ;;  %v661_v2 = vpop.f32.mrb[6].mxu0 }
 0x2cd   :  { %v401_v3 = vadd.f32 %v661_v2, %v565_v61  ;;  %v392_v4 = vpop.f32.mrb[7].mxu0  ;;  %v406_v6 = vmax.f32 %v398_v63, 0.0 }
 0x2ce   :  { %v393_v5 = vadd.f32 %v565_v61, %v392_v4  ;;  %v404_v8 = vmax.f32 %v390_v1, 0.0 }
 0x2cf   :  { %v407_v7 = vmax.f32 %v401_v3, 0.0 }
 0x2d0   :  { %v405_v9 = vmax.f32 %v393_v5, 0.0 }
 0x2d1   :  { %v409_v10 = vpack.c.bf16 %v407_v7, %v406_v6 }
 0x2d2   :  { %v408_v11 = vpack.c.bf16 %v405_v9, %v404_v8 }
 0x2d4   :  { %678 = vmatprep.mubr.bf16.mxu1 %v408_v11 }
 0x2d5   :  { %679 = vmatmul.mubr.bf16.vlgmr.msra.gmra.mrb[4].mxu1 %v409_v10 }
 0x3a8   :  { %v680_v13 = vpop.f32.mrb[4].mxu1 }
 0x3a9   :  { %v524_v14 = vadd.f32 %v680_v13, %v574_v12  ;;  %v515_v15 = vpop.f32.mrb[5].mxu1 }
 0x3aa   :  { %v516_v16 = vadd.f32 %v574_v12, %v515_v15  ;;  %v681_v17 = vpop.f32.mrb[6].mxu1 }
 0x3ab   :  { %532 = vst [vmem:[#allocation8 + $0x10] sm:$0xff] %v524_v14  ;;  %v527_v18 = vadd.f32 %v681_v17, %v574_v12  ;;  %v518_v19 = vpop.f32.mrb[7].mxu1 }
 0x3ac   :  { %530 = vst [vmem:[#allocation8] sm:$0xff] %v516_v16  ;;  %v519_v20 = vadd.f32 %v574_v12, %v518_v19 }
 0x3ad   :  { %533 = vst [vmem:[#allocation8 + $0x18] sm:$0xff] %v527_v18 }
 0x3ae   :  { %531 = vst [vmem:[#allocation8 + $0x8] sm:$0xff] %v519_v20 }
 0x3af   :  { %792 = shalt.err (!%p789_p0)
}
 0x3b0   :  { %s793_s21 = scalar_lea.hbm %s988_s9, 512 }
 0x3b1   :  { %p794_p1 = scmp.ne.s32.totalorder %s988_s9, %s793_s21  ;;  %p797_p2 = scmp.lt.u32.totalorder %s793_s21, %s988_s9 }
 0x3b3   :  { %p799_p3 = pnand %p797_p2, %p794_p1 }
 0x3b5   :  { %802 = shalt.err (!%p799_p3)
}
 0x3b6   :  { %s815_s10 = smov 128   ;;  %s816_s14 = smov 8  }
 0x3b7   :  { %545 = dma.vmem_to_hbm [thread:$0]  %s540_s30, 512, %s988_s9, [#allocation4], %s815_s10, %s815_s10, %s816_s14  }
 0x3b8   :  { %807 = dma.done.wait [#allocation4], 512  }
 0x3b9   :  { %808 = vsyncadd [#allocation4], 4294966784 }
 0x3ba   :  { %549 = vsyncpa [#allocation3], 1 }
 0x3bb   :  { %550 = vsyncpa [#allocation6], 1 }
 0x3bc   :  { %551 = vsyncpa [#allocation4], 1 }

</bundles_post_ra>
